<compile_context>
chip_gen: v6e
topology: v6e:2x2x1
jax: 0.10.0
libtpu: 0.0.40
codegen_flags: <defaults>
</compile_context>

<pallas_src>
import functools

import jax
import jax.numpy as jnp
import numpy as np
from jax.experimental import pallas as pl
from jax.experimental.pallas import tpu as pltpu

_LANES = 128
_CHUNK_ROWS = 32                            # (32, 128) = native int8 tile, 4 int32 vregs
_CHUNK_TOKENS = _CHUNK_ROWS * _LANES        # 4096 tokens per chunk
_MAX_CHUNKS_PER_BLOCK = 64                  # 262,144 tokens / grid step (~1.25 MiB in+out)
_SPLIT_CHUNKS = 16                          # above this, split into >=2 grid steps (v7x)


# ----------------------------------------------------------------------------
# Kernel
# ----------------------------------------------------------------------------
def _residue_to_int_kernel(n_valid_ref, vocab_ref, seq_ref, out_ref, *,
                           vocab_size, unk_idx, chunks_per_block):
    """Vocabulary lookup with UNK fallback.

    n_valid_ref : (1,) int32 SMEM -- number of chunks holding real tokens
    vocab_ref   : (V,) int32 SMEM -- packed vocab codes (scalar-prefetched)
    seq_ref     : (chunks_per_block, 32, 128) int32 VMEM -- packed token codes
    out_ref     : (chunks_per_block, 32, 128) int8  VMEM -- vocab indices
    """
    block = pl.program_id(0)
    base = block * chunks_per_block
    # Chunks of this block that contain real (non-pad) tokens.
    valid_here = jnp.clip(n_valid_ref[0] - base, 0, chunks_per_block)

    def lookup_chunk(c, carry):
        chunk = seq_ref[c]                                        # (32, 128) int32
        acc = jnp.full(chunk.shape, jnp.int32(unk_idx), dtype=jnp.int32)

        # Short unrolled scan over the SMEM-resident vocab: one compare + one
        # select per entry on the VPU.  Starting the accumulator at unk_idx
        # gives the UNK fallback for free (pad code 0 never matches either).
        def scan(v, a):
            return jnp.where(chunk == vocab_ref[v], v, a)

        acc = jax.lax.fori_loop(0, vocab_size, scan, acc, unroll=True)
        out_ref[c] = acc.astype(jnp.int8)
        return carry

    jax.lax.fori_loop(0, valid_here, lookup_chunk, 0)

    # Padded chunks: no vocab scan, just a deterministic fill (host slices it off).
    def fill_chunk(c, carry):
        out_ref[c] = jnp.full((_CHUNK_ROWS, _LANES), unk_idx, dtype=jnp.int8)
        return carry

    jax.lax.fori_loop(valid_here, chunks_per_block, fill_chunk, 0)


# ----------------------------------------------------------------------------
# Jitted lookup (one compile per (padded-chunk-count, chunks_per_block) bucket)
# ----------------------------------------------------------------------------
@functools.partial(
    jax.jit, static_argnames=("vocab_size", "unk_idx", "chunks_per_block")
)
def _lookup(n_valid, vocab_codes, seq_3d, *, vocab_size, unk_idx, chunks_per_block):
    n_chunks = seq_3d.shape[0]                      # power-of-two, multiple of cpb
    grid = n_chunks // chunks_per_block
    kernel = functools.partial(
        _residue_to_int_kernel,
        vocab_size=vocab_size, unk_idx=unk_idx, chunks_per_block=chunks_per_block,
    )
    out = pl.pallas_call(
        kernel,
        out_shape=jax.ShapeDtypeStruct((n_chunks, _CHUNK_ROWS, _LANES), jnp.int8),
        grid_spec=pltpu.PrefetchScalarGridSpec(
            num_scalar_prefetch=2,                  # n_valid, vocab codes -> SMEM
            grid=(grid,),
            in_specs=[
                pl.BlockSpec((chunks_per_block, _CHUNK_ROWS, _LANES),
                             lambda i, n_valid, vocab: (i, 0, 0)),
            ],
            out_specs=pl.BlockSpec((chunks_per_block, _CHUNK_ROWS, _LANES),
                                   lambda i, n_valid, vocab: (i, 0, 0)),
        ),
        compiler_params=pltpu.CompilerParams(
            dimension_semantics=("parallel",),      # shard blocks across TCs (v7x)
        ),
    )(n_valid, vocab_codes, seq_3d)
    return out.reshape(-1)                          # (n_chunks * 4096,) int8


# ----------------------------------------------------------------------------
# Host-side glue
# ----------------------------------------------------------------------------
def _encode_tokens(tokens) -> np.ndarray:
    """Vectorized packing of ASCII tokens (1..4 chars) into positive int32 codes."""
    tokens = list(tokens)
    if not tokens:
        return np.zeros((0,), dtype=np.int32)
    lens = [len(t) for t in tokens]
    if min(lens) < 1 or max(lens) > 4:
        raise ValueError("tokens must be 1..4 ASCII characters for int32 packing")
    raw = np.array(tokens, dtype="S4")              # fixed width, right NUL-padded
    u8 = raw.view(np.uint8).reshape(len(tokens), 4).astype(np.int32)
    # First byte is printable ASCII (0 < b < 128) => code is always > 0, so the
    # sequence pad value 0 can never alias a real token.
    return (u8[:, 0] << 24) | (u8[:, 1] << 16) | (u8[:, 2] << 8) | u8[:, 3]


def _pick_chunks_per_block(n_chunks_pad: int) -> int:
    """Block granularity: single block for short inputs, >=2 big blocks for long ones."""
    if n_chunks_pad <= _SPLIT_CHUNKS:
        return n_chunks_pad
    return min(_MAX_CHUNKS_PER_BLOCK, n_chunks_pad // 2)


class ResidueToInt:
    """JAX/Pallas port of the PyTorch ResidueToInt module."""

    def __init__(self, all_token_elements):
        # Automatic sorting, same as the torch module.
        self.all_token_elements = sorted(all_token_elements)
        self.aa_to_int_token = {t: i for i, t in enumerate(self.all_token_elements)}
        self._unk_idx = self.aa_to_int_token["UNK"]
        self._vocab_size = len(self.all_token_elements)
        # int8 output (torch dtype) would silently wrap above 127 entries.
        assert self._vocab_size <= 127, "vocabulary too large for int8 indices"
        # Packed vocab codes kept resident on device; scalar-prefetched to SMEM.
        self._vocab_codes = jnp.asarray(
            _encode_tokens(self.all_token_elements), dtype=jnp.int32
        )

    def __call__(self, seq):
        """seq: list of string tokens. Returns jnp.int8 array of shape (len(seq),)."""
        s = len(seq)
        if s == 0:
            return jnp.zeros((0,), dtype=jnp.int8)
        n_chunks = pl.cdiv(s, _CHUNK_TOKENS)
        n_chunks_pad = pl.next_power_of_2(n_chunks)      # bucket compiles
        s_pad = n_chunks_pad * _CHUNK_TOKENS
        codes = np.zeros((s_pad,), dtype=np.int32)       # pad code 0 never matches
        codes[:s] = _encode_tokens(seq)
        seq_3d = jnp.asarray(codes.reshape(n_chunks_pad, _CHUNK_ROWS, _LANES))
        n_valid = jnp.asarray([n_chunks], dtype=jnp.int32)
        out = _lookup(
            n_valid, self._vocab_codes, seq_3d,
            vocab_size=self._vocab_size, unk_idx=self._unk_idx,
            chunks_per_block=_pick_chunks_per_block(n_chunks_pad),
        )
        # Match torch.tensor(..., dtype=torch.int8) of shape (S,).
        return out[:s]


# ----------------------------------------------------------------------------
# Demo / self-check
# ----------------------------------------------------------------------------
if __name__ == "__main__":
    amino_acids = [
        "ALA", "ARG", "ASN", "ASP", "CYS", "GLN", "GLU", "GLY", "HIS", "ILE",
        "LEU", "LYS", "MET", "PHE", "PRO", "SER", "THR", "TRP", "TYR", "VAL",
        "UNK",
    ]
    module = ResidueToInt(amino_acids)

    # Candidate pool includes one out-of-vocabulary token to exercise the
    # UNK fallback path.
    candidates = amino_acids[:20] + ["XYZ"]

    def py_reference(seq):
        ref = []
        for t in seq:
            try:
                ref.append(module.aa_to_int_token[t])
            except KeyError:
                ref.append(module.aa_to_int_token["UNK"])
        return ref

    key = jax.random.PRNGKey(0)

    # --- small sequence (single chunk, single block) ---
    seq_len = 8
    idx = jax.random.randint(key, (seq_len,), 0, len(candidates))
    seq = [candidates[int(i)] for i in idx]
    out = jax.block_until_ready(module(seq))
    assert out.dtype == jnp.int8, out.dtype
    assert out.shape == (seq_len,), out.shape
    assert [int(v) for v in out] == py_reference(seq)

    # --- longer sequence (3 valid chunks padded to 4: exercises the
    #     valid-chunk bound and padded-chunk skip path) ---
    long_len = 9000
    idx2 = jax.random.randint(jax.random.PRNGKey(1), (long_len,), 0, len(candidates))
    seq2 = [candidates[int(i)] for i in np.asarray(idx2)]
    out2 = jax.block_until_ready(module(seq2))
    assert out2.dtype == jnp.int8 and out2.shape == (long_len,)
    assert np.array_equal(np.asarray(out2), np.asarray(py_reference(seq2), dtype=np.int8))

    print("KERNEL_OK")
</pallas_src>

<mosaic_0001>
module attributes {stable_mosaic.version = 11 : i64} {
  func.func @_residue_to_int_kernel(%arg0: i32, %arg1: memref<1xi32, #tpu.memory_space<smem>>, %arg2: memref<21xi32, #tpu.memory_space<smem>>, %arg3: memref<1x32x128xi32, #tpu.memory_space<vmem>>, %arg4: memref<1x32x128xi8, #tpu.memory_space<vmem>>) attributes {dimension_semantics = [#tpu.dimension_semantics<parallel>], iteration_bounds = array<i64: 1>, scalar_prefetch = 2 : i64, scratch_operands = 0 : i64, tpu.core_type = #tpu.core_type<tc>, window_params = [{transform_indices = @transform_0, window_bounds = array<i64: 1, 32, 128>}, {transform_indices = @transform_1, window_bounds = array<i64: 1, 32, 128>}]} {
    %c1_i32 = arith.constant 1 : i32
    %0 = arith.muli %arg0, %c1_i32 : i32
    %c0 = arith.constant 0 : index
    %1 = memref.load %arg1[%c0] : memref<1xi32, #tpu.memory_space<smem>>
    %2 = arith.subi %1, %0 : i32
    %c0_i32 = arith.constant 0 : i32
    %c1_i32_0 = arith.constant 1 : i32
    %3 = arith.maxsi %c0_i32, %2 : i32
    %4 = arith.minsi %c1_i32_0, %3 : i32
    %c0_i32_1 = arith.constant 0 : i32
    %c0_i32_2 = arith.constant 0 : i32
    %5 = arith.subi %4, %c0_i32_2 : i32
    %6 = arith.addi %c0_i32_2, %5 : i32
    %c1_i32_3 = arith.constant 1 : i32
    scf.for %arg5 = %c0_i32_2 to %6 step %c1_i32_3  : i32 {
      %9 = arith.index_cast %arg5 : i32 to index
      %c0_7 = arith.constant 0 : index
      %c0_8 = arith.constant 0 : index
      %10 = vector.load %arg3[%9, %c0_7, %c0_8] : memref<1x32x128xi32, #tpu.memory_space<vmem>>, vector<1x32x128xi32>
      %11 = vector.shape_cast %10 : vector<1x32x128xi32> to vector<32x128xi32>
      %c19_i32 = arith.constant 19 : i32
      %12 = vector.broadcast %c19_i32 : i32 to vector<32x128xi32>
      %c0_i32_9 = arith.constant 0 : i32
      %13 = arith.index_cast %c0_i32_9 : i32 to index
      %14 = memref.load %arg2[%13] : memref<21xi32, #tpu.memory_space<smem>>
      %15 = vector.broadcast %14 : i32 to vector<32x128xi32>
      %16 = arith.cmpi eq, %11, %15 : vector<32x128xi32>
      %17 = vector.broadcast %c0_i32_9 : i32 to vector<32x128xi32>
      %18 = arith.select %16, %17, %12 : vector<32x128xi1>, vector<32x128xi32>
      %c1_i32_10 = arith.constant 1 : i32
      %19 = arith.index_cast %c1_i32_10 : i32 to index
      %20 = memref.load %arg2[%19] : memref<21xi32, #tpu.memory_space<smem>>
      %21 = vector.broadcast %20 : i32 to vector<32x128xi32>
      %22 = arith.cmpi eq, %11, %21 : vector<32x128xi32>
      %23 = vector.broadcast %c1_i32_10 : i32 to vector<32x128xi32>
      %24 = arith.select %22, %23, %18 : vector<32x128xi1>, vector<32x128xi32>
      %c2_i32 = arith.constant 2 : i32
      %25 = arith.index_cast %c2_i32 : i32 to index
      %26 = memref.load %arg2[%25] : memref<21xi32, #tpu.memory_space<smem>>
      %27 = vector.broadcast %26 : i32 to vector<32x128xi32>
      %28 = arith.cmpi eq, %11, %27 : vector<32x128xi32>
      %29 = vector.broadcast %c2_i32 : i32 to vector<32x128xi32>
      %30 = arith.select %28, %29, %24 : vector<32x128xi1>, vector<32x128xi32>
      %c3_i32 = arith.constant 3 : i32
      %31 = arith.index_cast %c3_i32 : i32 to index
      %32 = memref.load %arg2[%31] : memref<21xi32, #tpu.memory_space<smem>>
      %33 = vector.broadcast %32 : i32 to vector<32x128xi32>
      %34 = arith.cmpi eq, %11, %33 : vector<32x128xi32>
      %35 = vector.broadcast %c3_i32 : i32 to vector<32x128xi32>
      %36 = arith.select %34, %35, %30 : vector<32x128xi1>, vector<32x128xi32>
      %c4_i32 = arith.constant 4 : i32
      %37 = arith.index_cast %c4_i32 : i32 to index
      %38 = memref.load %arg2[%37] : memref<21xi32, #tpu.memory_space<smem>>
      %39 = vector.broadcast %38 : i32 to vector<32x128xi32>
      %40 = arith.cmpi eq, %11, %39 : vector<32x128xi32>
      %41 = vector.broadcast %c4_i32 : i32 to vector<32x128xi32>
      %42 = arith.select %40, %41, %36 : vector<32x128xi1>, vector<32x128xi32>
      %c5_i32 = arith.constant 5 : i32
      %43 = arith.index_cast %c5_i32 : i32 to index
      %44 = memref.load %arg2[%43] : memref<21xi32, #tpu.memory_space<smem>>
      %45 = vector.broadcast %44 : i32 to vector<32x128xi32>
      %46 = arith.cmpi eq, %11, %45 : vector<32x128xi32>
      %47 = vector.broadcast %c5_i32 : i32 to vector<32x128xi32>
      %48 = arith.select %46, %47, %42 : vector<32x128xi1>, vector<32x128xi32>
      %c6_i32 = arith.constant 6 : i32
      %49 = arith.index_cast %c6_i32 : i32 to index
      %50 = memref.load %arg2[%49] : memref<21xi32, #tpu.memory_space<smem>>
      %51 = vector.broadcast %50 : i32 to vector<32x128xi32>
      %52 = arith.cmpi eq, %11, %51 : vector<32x128xi32>
      %53 = vector.broadcast %c6_i32 : i32 to vector<32x128xi32>
      %54 = arith.select %52, %53, %48 : vector<32x128xi1>, vector<32x128xi32>
      %c7_i32 = arith.constant 7 : i32
      %55 = arith.index_cast %c7_i32 : i32 to index
      %56 = memref.load %arg2[%55] : memref<21xi32, #tpu.memory_space<smem>>
      %57 = vector.broadcast %56 : i32 to vector<32x128xi32>
      %58 = arith.cmpi eq, %11, %57 : vector<32x128xi32>
      %59 = vector.broadcast %c7_i32 : i32 to vector<32x128xi32>
      %60 = arith.select %58, %59, %54 : vector<32x128xi1>, vector<32x128xi32>
      %c8_i32 = arith.constant 8 : i32
      %61 = arith.index_cast %c8_i32 : i32 to index
      %62 = memref.load %arg2[%61] : memref<21xi32, #tpu.memory_space<smem>>
      %63 = vector.broadcast %62 : i32 to vector<32x128xi32>
      %64 = arith.cmpi eq, %11, %63 : vector<32x128xi32>
      %65 = vector.broadcast %c8_i32 : i32 to vector<32x128xi32>
      %66 = arith.select %64, %65, %60 : vector<32x128xi1>, vector<32x128xi32>
      %c9_i32 = arith.constant 9 : i32
      %67 = arith.index_cast %c9_i32 : i32 to index
      %68 = memref.load %arg2[%67] : memref<21xi32, #tpu.memory_space<smem>>
      %69 = vector.broadcast %68 : i32 to vector<32x128xi32>
      %70 = arith.cmpi eq, %11, %69 : vector<32x128xi32>
      %71 = vector.broadcast %c9_i32 : i32 to vector<32x128xi32>
      %72 = arith.select %70, %71, %66 : vector<32x128xi1>, vector<32x128xi32>
      %c10_i32 = arith.constant 10 : i32
      %73 = arith.index_cast %c10_i32 : i32 to index
      %74 = memref.load %arg2[%73] : memref<21xi32, #tpu.memory_space<smem>>
      %75 = vector.broadcast %74 : i32 to vector<32x128xi32>
      %76 = arith.cmpi eq, %11, %75 : vector<32x128xi32>
      %77 = vector.broadcast %c10_i32 : i32 to vector<32x128xi32>
      %78 = arith.select %76, %77, %72 : vector<32x128xi1>, vector<32x128xi32>
      %c11_i32 = arith.constant 11 : i32
      %79 = arith.index_cast %c11_i32 : i32 to index
      %80 = memref.load %arg2[%79] : memref<21xi32, #tpu.memory_space<smem>>
      %81 = vector.broadcast %80 : i32 to vector<32x128xi32>
      %82 = arith.cmpi eq, %11, %81 : vector<32x128xi32>
      %83 = vector.broadcast %c11_i32 : i32 to vector<32x128xi32>
      %84 = arith.select %82, %83, %78 : vector<32x128xi1>, vector<32x128xi32>
      %c12_i32 = arith.constant 12 : i32
      %85 = arith.index_cast %c12_i32 : i32 to index
      %86 = memref.load %arg2[%85] : memref<21xi32, #tpu.memory_space<smem>>
      %87 = vector.broadcast %86 : i32 to vector<32x128xi32>
      %88 = arith.cmpi eq, %11, %87 : vector<32x128xi32>
      %89 = vector.broadcast %c12_i32 : i32 to vector<32x128xi32>
      %90 = arith.select %88, %89, %84 : vector<32x128xi1>, vector<32x128xi32>
      %c13_i32 = arith.constant 13 : i32
      %91 = arith.index_cast %c13_i32 : i32 to index
      %92 = memref.load %arg2[%91] : memref<21xi32, #tpu.memory_space<smem>>
      %93 = vector.broadcast %92 : i32 to vector<32x128xi32>
      %94 = arith.cmpi eq, %11, %93 : vector<32x128xi32>
      %95 = vector.broadcast %c13_i32 : i32 to vector<32x128xi32>
      %96 = arith.select %94, %95, %90 : vector<32x128xi1>, vector<32x128xi32>
      %c14_i32 = arith.constant 14 : i32
      %97 = arith.index_cast %c14_i32 : i32 to index
      %98 = memref.load %arg2[%97] : memref<21xi32, #tpu.memory_space<smem>>
      %99 = vector.broadcast %98 : i32 to vector<32x128xi32>
      %100 = arith.cmpi eq, %11, %99 : vector<32x128xi32>
      %101 = vector.broadcast %c14_i32 : i32 to vector<32x128xi32>
      %102 = arith.select %100, %101, %96 : vector<32x128xi1>, vector<32x128xi32>
      %c15_i32 = arith.constant 15 : i32
      %103 = arith.index_cast %c15_i32 : i32 to index
      %104 = memref.load %arg2[%103] : memref<21xi32, #tpu.memory_space<smem>>
      %105 = vector.broadcast %104 : i32 to vector<32x128xi32>
      %106 = arith.cmpi eq, %11, %105 : vector<32x128xi32>
      %107 = vector.broadcast %c15_i32 : i32 to vector<32x128xi32>
      %108 = arith.select %106, %107, %102 : vector<32x128xi1>, vector<32x128xi32>
      %c16_i32 = arith.constant 16 : i32
      %109 = arith.index_cast %c16_i32 : i32 to index
      %110 = memref.load %arg2[%109] : memref<21xi32, #tpu.memory_space<smem>>
      %111 = vector.broadcast %110 : i32 to vector<32x128xi32>
      %112 = arith.cmpi eq, %11, %111 : vector<32x128xi32>
      %113 = vector.broadcast %c16_i32 : i32 to vector<32x128xi32>
      %114 = arith.select %112, %113, %108 : vector<32x128xi1>, vector<32x128xi32>
      %c17_i32 = arith.constant 17 : i32
      %115 = arith.index_cast %c17_i32 : i32 to index
      %116 = memref.load %arg2[%115] : memref<21xi32, #tpu.memory_space<smem>>
      %117 = vector.broadcast %116 : i32 to vector<32x128xi32>
      %118 = arith.cmpi eq, %11, %117 : vector<32x128xi32>
      %119 = vector.broadcast %c17_i32 : i32 to vector<32x128xi32>
      %120 = arith.select %118, %119, %114 : vector<32x128xi1>, vector<32x128xi32>
      %c18_i32 = arith.constant 18 : i32
      %121 = arith.index_cast %c18_i32 : i32 to index
      %122 = memref.load %arg2[%121] : memref<21xi32, #tpu.memory_space<smem>>
      %123 = vector.broadcast %122 : i32 to vector<32x128xi32>
      %124 = arith.cmpi eq, %11, %123 : vector<32x128xi32>
      %125 = vector.broadcast %c18_i32 : i32 to vector<32x128xi32>
      %126 = arith.select %124, %125, %120 : vector<32x128xi1>, vector<32x128xi32>
      %c19_i32_11 = arith.constant 19 : i32
      %127 = arith.index_cast %c19_i32_11 : i32 to index
      %128 = memref.load %arg2[%127] : memref<21xi32, #tpu.memory_space<smem>>
      %129 = vector.broadcast %128 : i32 to vector<32x128xi32>
      %130 = arith.cmpi eq, %11, %129 : vector<32x128xi32>
      %131 = vector.broadcast %c19_i32_11 : i32 to vector<32x128xi32>
      %132 = arith.select %130, %131, %126 : vector<32x128xi1>, vector<32x128xi32>
      %c20_i32 = arith.constant 20 : i32
      %133 = arith.index_cast %c20_i32 : i32 to index
      %134 = memref.load %arg2[%133] : memref<21xi32, #tpu.memory_space<smem>>
      %135 = vector.broadcast %134 : i32 to vector<32x128xi32>
      %136 = arith.cmpi eq, %11, %135 : vector<32x128xi32>
      %137 = vector.broadcast %c20_i32 : i32 to vector<32x128xi32>
      %138 = arith.select %136, %137, %132 : vector<32x128xi1>, vector<32x128xi32>
      %c21_i32 = arith.constant 21 : i32
      %139 = arith.trunci %138 : vector<32x128xi32> to vector<32x128xi8>
      %140 = arith.index_cast %arg5 : i32 to index
      %c0_12 = arith.constant 0 : index
      %c0_13 = arith.constant 0 : index
      %141 = vector.load %arg4[%140, %c0_12, %c0_13] : memref<1x32x128xi8, #tpu.memory_space<vmem>>, vector<1x32x128xi8>
      %142 = vector.shape_cast %141 : vector<1x32x128xi8> to vector<32x128xi8>
      %143 = vector.shape_cast %139 : vector<32x128xi8> to vector<1x32x128xi8>
      tpu.vector_store %arg4[%140, %c0_12, %c0_13], %143 {strides = array<i32>} : memref<1x32x128xi8, #tpu.memory_space<vmem>>, vector<1x32x128xi8>,
    }
    %c0_i32_4 = arith.constant 0 : i32
    %c1_i32_5 = arith.constant 1 : i32
    %7 = arith.subi %c1_i32_5, %4 : i32
    %8 = arith.addi %4, %7 : i32
    %c1_i32_6 = arith.constant 1 : i32
    scf.for %arg5 = %4 to %8 step %c1_i32_6  : i32 {
      %c19_i8 = arith.constant 19 : i8
      %9 = vector.broadcast %c19_i8 : i8 to vector<32x128xi8>
      %10 = arith.index_cast %arg5 : i32 to index
      %c0_7 = arith.constant 0 : index
      %c0_8 = arith.constant 0 : index
      %11 = vector.load %arg4[%10, %c0_7, %c0_8] : memref<1x32x128xi8, #tpu.memory_space<vmem>>, vector<1x32x128xi8>
      %12 = vector.shape_cast %11 : vector<1x32x128xi8> to vector<32x128xi8>
      %13 = vector.shape_cast %9 : vector<32x128xi8> to vector<1x32x128xi8>
      tpu.vector_store %arg4[%10, %c0_7, %c0_8], %13 {strides = array<i32>} : memref<1x32x128xi8, #tpu.memory_space<vmem>>, vector<1x32x128xi8>,
    }
    return
  }
  func.func @transform_0(%arg0: i32, %arg1: memref<1xi32, #tpu.memory_space<smem>>, %arg2: memref<21xi32, #tpu.memory_space<smem>>) -> (i32, i32, i32) {
    %c0_i32 = arith.constant 0 : i32
    %c0_i32_0 = arith.constant 0 : i32
    %c0_i32_1 = arith.constant 0 : i32
    return %arg0, %c0_i32, %c0_i32_0 : i32, i32, i32
  }
  func.func @transform_1(%arg0: i32, %arg1: memref<1xi32, #tpu.memory_space<smem>>, %arg2: memref<21xi32, #tpu.memory_space<smem>>) -> (i32, i32, i32) {
    %c0_i32 = arith.constant 0 : i32
    %c0_i32_0 = arith.constant 0 : i32
    %c0_i32_1 = arith.constant 0 : i32
    return %arg0, %c0_i32, %c0_i32_0 : i32, i32, i32
  }
}

</mosaic_0001>

<bundles_post_ra>
// kernel: _lookup.1
= control target key start
LH: loop header
LB: loop body
LE: loop exit
PB: predicated region body
PF: predicated region fallthrough
CT: control target
= control target key end

     0   :  { %s765_s0 = inlined_call_operand.<no memory space> [shape: s32[1], index: 0, kind: input, shape index: {}]   ;;  %s766_s1 = inlined_call_operand.vmem [shape: s32[21], index: 1, kind: input, shape index: {}]   ;;  %s767_s2 = inlined_call_operand.hbm [shape: s32[1,32,128], index: 2, kind: input, shape index: {}]   ;;  %s768_s3 = inlined_call_operand.hbm [shape: s8[1,32,128], index: 3, kind: output, shape index: {}]  }
   0x1   :  { %s9_s14 = sshll.u32 %s766_s1, 4  ;;  %s10_s14 = int_to_ptr.vmem [resolvable:$true] %s9_s14 }
   0x2   :  { %s382_s15 = scalar_lea.vmem %s10_s14, 16  ;;  %p387_p1 = scmp.lt.s32.totalorder %s10_s14, %s10_s14 }
   0x3   :  { %p383_p0 = scmp.ne.s32.totalorder %s10_s14, %s382_s15  ;;  %p388_p2 = scmp.lt.s32.totalorder %s382_s15, %s382_s15 }
   0x5   :  { %p389_p3 = por %p388_p2, %p387_p1 }
   0x7   :  { %p390_p4 = pnand %p389_p3, %p383_p0 }
   0x9   :  { %393 = shalt.err (!%p390_p4)  }
   0xa   :  { %s456_s16 = smov [#allocation4]  }
   0xb   :  { %12 = dma.vmem_to_smem %s10_s14, 16, %s456_s16, [#allocation2] }
   0xc   :  { %442 = dma.done.wait [#allocation2], 16 }
   0xd   :  { %443 = vsyncadd [#allocation2], 4294967280 }
   0xe   :  { %14 = sfence }
   0xf   :  { %15 = vsyncpa [#allocation6], 0 }
  0x10   :  { %16 = vsyncpa [#allocation7], 0  ;;  %s457_s17 = smov [#allocation5]  }
  0x11   :  { %s22_s18 = sshll.u32 %s457_s17, 4  ;;  %s23_s18 = int_to_ptr.vmem [resolvable:$true] %s22_s18 }
  0x12   :  { %s402_s19 = scalar_lea.vmem %s23_s18, 512  ;;  %p407_p6 = scmp.lt.s32.totalorder %s23_s18, %s23_s18 }
  0x13   :  { %p403_p5 = scmp.ne.s32.totalorder %s23_s18, %s402_s19  ;;  %p408_p7 = scmp.lt.s32.totalorder %s402_s19, %s402_s19 }
  0x15   :  { %p409_p8 = por %p408_p7, %p407_p6 }
  0x17   :  { %p410_p9 = pnand %p409_p8, %p403_p5 }
  0x19   :  { %413 = shalt.err (!%p410_p9)
}
  0x1a   :  { %s458_s1 = smov 128   ;;  %s459_s20 = smov 8  }
  0x1b   :  { %28 = dma.hbm_to_vmem [thread:$0]  %s767_s2, 512, %s23_s18, [#allocation6], %s458_s1, %s458_s1, %s459_s20  }
  0x1c   :  { %444 = dma.done.wait [#allocation6], 512  }
  0x1d   :  { %445 = vsyncadd [#allocation6], 4294966784  ;;  %p35_p10 = scmp.gt.s32.totalorder %s765_s0, 0  ;;  %p322_p11 = scmp.lt.s32.totalorder %s765_s0, 1 }
  0x1f   :  { %s770_s0 = smov (!%p35_p10, %s765_s0), 0 }
  0x20   :  { %s772_s0 = smov (!%p322_p11, %s770_s0), 1 }
  0x21   :  { %p327_p12 = scmp.le.s32.totalorder %s772_s0, 0 }
  0x22   :  { %s503_s2 = smov (!%p327_p12), 0  }
  0x23   :  { %314 = sbr.rel (%p327_p12) target bundleno = 106 (0x6a), region = 39 }
  0x28 LB: > { %s51_s29 = sld [smem:[#allocation4]]  ;;  %s328_s4 = sshll.u32 %s450_s2, 5  ;;  %v460_v4 = vmov 19   ;;  %s450_s2 = sphi %s503_s2, %s42_s2  }
  0x29   : > { %s329_s30 = sld [smem:[#allocation4 + $0x1]]  ;;  %s509_s7 = scalar_lea.vmem [#allocation5], %s328_s4 }
  0x2a   : > { %s330_s5 = sld [smem:[#allocation4 + $0x2]]  ;;  %v512_v0 = vld [vmem:[%s509_s7] sm:$0xff]  ;;  %v515_v1 = vld [vmem:[%s509_s7 + $0x8] sm:$0xff]  ;;  %v618_v50 = vld [vmem:[%s509_s7 + $0x10] sm:$0xff]  ;;  %s355_s24 = sshll.u32 %s450_s2, 3 }
  0x2b   : > { %s331_s6 = sld [smem:[#allocation4 + $0x3]]  ;;  %s652_s25 = scalar_lea.vmem [#allocation8], %s355_s24 }
  0x2c   : > { %s332_s8 = sld [smem:[#allocation4 + $0x4]]  ;;  %s42_s2 = sadd.s32 1, %s450_s2  }
  0x2d   : > { %s333_s9 = sld [smem:[#allocation4 + $0x5]]  ;;  %p41_p13 = scmp.ge.s32.totalorder %s42_s2, %s772_s0 }
  0x2e   : > { %v517_v2 = vstv %s51_s29  ;;  %s334_s10 = sld [smem:[#allocation4 + $0x6]] }
  0x2f   : > { %vm53_vm0 = vcmp.eq.s32.totalorder %v512_v0, %v517_v2  ;;  %v521_v3 = vstv %s329_s30  ;;  %s335_s11 = sld [smem:[#allocation4 + $0x7]]  ;;  %vm54_vm1 = vcmp.eq.s32.totalorder %v515_v1, %v517_v2 }
  0x30   : > { %v57_v5 = vsel %vm53_vm0, 0, %v460_v4  ;;  %vm63_vm2 = vcmp.eq.s32.totalorder %v512_v0, %v521_v3  ;;  %v528_v6 = vstv %s330_s5  ;;  %s336_s12 = sld [smem:[#allocation4 + $0x8]]  ;;  %v58_v7 = vsel %vm54_vm1, 0, %v460_v4 }
  0x31   : > { %v67_v8 = vsel %vm63_vm2, 1, %v57_v5  ;;  %vm73_vm3 = vcmp.eq.s32.totalorder %v512_v0, %v528_v6  ;;  %v533_v9 = vstv %s331_s6  ;;  %s337_s13 = sld [smem:[#allocation4 + $0x9]]  ;;  %vm64_vm4 = vcmp.eq.s32.totalorder %v515_v1, %v521_v3 }
  0x32   : > { %v77_v10 = vsel %vm73_vm3, 2, %v67_v8  ;;  %vm83_vm5 = vcmp.eq.s32.totalorder %v512_v0, %v533_v9  ;;  %v539_v11 = vstv %s332_s8  ;;  %s338_s14 = sld [smem:[#allocation4 + $0xa]]  ;;  %v68_v12 = vsel %vm64_vm4, 1, %v58_v7 }
  0x33   : > { %v87_v13 = vsel %vm83_vm5, 3, %v77_v10  ;;  %vm93_vm6 = vcmp.eq.s32.totalorder %v512_v0, %v539_v11  ;;  %v543_v14 = vstv %s333_s9  ;;  %s339_s15 = sld [smem:[#allocation4 + $0xb]]  ;;  %vm74_vm7 = vcmp.eq.s32.totalorder %v515_v1, %v528_v6 }
  0x34   : > { %v97_v15 = vsel %vm93_vm6, 4, %v87_v13  ;;  %vm103_vm8 = vcmp.eq.s32.totalorder %v512_v0, %v543_v14  ;;  %v549_v16 = vstv %s334_s10  ;;  %s340_s16 = sld [smem:[#allocation4 + $0xc]]  ;;  %v78_v17 = vsel %vm74_vm7, 2, %v68_v12 }
  0x35   : > { %v107_v18 = vsel %vm103_vm8, 5, %v97_v15  ;;  %vm113_vm9 = vcmp.eq.s32.totalorder %v512_v0, %v549_v16  ;;  %v553_v19 = vstv %s335_s11  ;;  %s341_s17 = sld [smem:[#allocation4 + $0xd]]  ;;  %vm84_vm10 = vcmp.eq.s32.totalorder %v515_v1, %v533_v9 }
  0x36   : > { %v117_v20 = vsel %vm113_vm9, 6, %v107_v18  ;;  %vm123_vm11 = vcmp.eq.s32.totalorder %v512_v0, %v553_v19  ;;  %v559_v21 = vstv %s336_s12  ;;  %s342_s18 = sld [smem:[#allocation4 + $0xe]]  ;;  %v88_v22 = vsel %vm84_vm10, 3, %v78_v17 }
  0x37   : > { %v127_v23 = vsel %vm123_vm11, 7, %v117_v20  ;;  %vm133_vm12 = vcmp.eq.s32.totalorder %v512_v0, %v559_v21  ;;  %v563_v24 = vstv %s337_s13  ;;  %s343_s19 = sld [smem:[#allocation4 + $0xf]]  ;;  %vm94_vm13 = vcmp.eq.s32.totalorder %v515_v1, %v539_v11  ;;  %v678_v20 = vld [vmem:[%s509_s7 + $0x18] sm:$0xff] }
  0x38   : > { %v137_v25 = vsel %vm133_vm12, 8, %v127_v23  ;;  %vm143_vm14 = vcmp.eq.s32.totalorder %v512_v0, %v563_v24  ;;  %v569_v26 = vstv %s338_s14  ;;  %s344_s1 = sld [smem:[#allocation4 + $0x10]]  ;;  %v98_v27 = vsel %vm94_vm13, 4, %v88_v22 }
  0x39   : > { %v147_v28 = vsel %vm143_vm14, 9, %v137_v25  ;;  %vm153_vm15 = vcmp.eq.s32.totalorder %v512_v0, %v569_v26  ;;  %v573_v29 = vstv %s339_s15  ;;  %s345_s20 = sld [smem:[#allocation4 + $0x11]]  ;;  %vm104_vm0 = vcmp.eq.s32.totalorder %v515_v1, %v543_v14 }
  0x3a   : > { %v157_v30 = vsel %vm153_vm15, 10, %v147_v28  ;;  %vm163_vm1 = vcmp.eq.s32.totalorder %v512_v0, %v573_v29  ;;  %v579_v31 = vstv %s340_s16  ;;  %s346_s21 = sld [smem:[#allocation4 + $0x12]]  ;;  %v108_v32 = vsel %vm104_vm0, 5, %v98_v27 }
  0x3b   : > { %v167_v33 = vsel %vm163_vm1, 11, %v157_v30  ;;  %vm173_vm2 = vcmp.eq.s32.totalorder %v512_v0, %v579_v31  ;;  %v583_v34 = vstv %s341_s17  ;;  %s347_s22 = sld [smem:[#allocation4 + $0x13]]  ;;  %vm114_vm3 = vcmp.eq.s32.totalorder %v515_v1, %v549_v16 }
  0x3c   : > { %v177_v35 = vsel %vm173_vm2, 12, %v167_v33  ;;  %vm183_vm4 = vcmp.eq.s32.totalorder %v512_v0, %v583_v34  ;;  %v589_v36 = vstv %s342_s18  ;;  %s348_s23 = sld [smem:[#allocation4 + $0x14]]  ;;  %v118_v37 = vsel %vm114_vm3, 6, %v108_v32 }
  0x3d   : > { %v187_v38 = vsel %vm183_vm4, 13, %v177_v35  ;;  %vm193_vm5 = vcmp.eq.s32.totalorder %v512_v0, %v589_v36  ;;  %v593_v39 = vstv %s343_s19  ;;  %vm124_vm6 = vcmp.eq.s32.totalorder %v515_v1, %v553_v19 }
  0x3e   : > { %v197_v40 = vsel %vm193_vm5, 14, %v187_v38  ;;  %vm203_vm7 = vcmp.eq.s32.totalorder %v512_v0, %v593_v39  ;;  %v599_v41 = vstv %s344_s1  ;;  %v128_v42 = vsel %vm124_vm6, 7, %v118_v37 }
  0x3f   : > { %v207_v43 = vsel %vm203_vm7, 15, %v197_v40  ;;  %vm213_vm8 = vcmp.eq.s32.totalorder %v512_v0, %v599_v41  ;;  %v603_v44 = vstv %s345_s20  ;;  %vm134_vm9 = vcmp.eq.s32.totalorder %v515_v1, %v559_v21 }
  0x40   : > { %v217_v45 = vsel %vm213_vm8, 16, %v207_v43  ;;  %vm223_vm10 = vcmp.eq.s32.totalorder %v512_v0, %v603_v44  ;;  %v609_v46 = vstv %s346_s21  ;;  %v138_v47 = vsel %vm134_vm9, 8, %v128_v42 }
  0x41   : > { %v227_v48 = vsel %vm223_vm10, 17, %v217_v45  ;;  %vm233_vm11 = vcmp.eq.s32.totalorder %v512_v0, %v609_v46  ;;  %v613_v49 = vstv %s347_s22  ;;  %vm144_vm12 = vcmp.eq.s32.totalorder %v515_v1, %v563_v24 }
  0x42   : > { %v237_v51 = vsel %vm233_vm11, 18, %v227_v48  ;;  %vm243_vm13 = vcmp.eq.s32.totalorder %v512_v0, %v613_v49  ;;  %v622_v52 = vstv %s348_s23  ;;  %v148_v53 = vsel %vm144_vm12, 9, %v138_v47 }
  0x43   : > { %v247_v54 = vsel %vm243_vm13, 19, %v237_v51  ;;  %vm253_vm14 = vcmp.eq.s32.totalorder %v512_v0, %v622_v52  ;;  %vm154_vm15 = vcmp.eq.s32.totalorder %v515_v1, %v569_v26  ;;  %vm164_vm0 = vcmp.eq.s32.totalorder %v515_v1, %v573_v29 }
  0x44   : > { %v257_v55 = vsel %vm253_vm14, 20, %v247_v54  ;;  %v158_v56 = vsel %vm154_vm15, 10, %v148_v53  ;;  %vm174_vm1 = vcmp.eq.s32.totalorder %v515_v1, %v579_v31  ;;  %vm184_vm2 = vcmp.eq.s32.totalorder %v515_v1, %v583_v34 }
  0x45   : > { %v261_v57 = vpack.c.b16 %v257_v55, %v257_v55  ;;  %v168_v58 = vsel %vm164_vm0, 11, %v158_v56  ;;  %vm194_vm3 = vcmp.eq.s32.totalorder %v515_v1, %v589_v36  ;;  %vm55_vm4 = vcmp.eq.s32.totalorder %v618_v50, %v517_v2 }
  0x46   : > { %v178_v59 = vsel %vm174_vm1, 12, %v168_v58  ;;  %vm204_vm5 = vcmp.eq.s32.totalorder %v515_v1, %v593_v39  ;;  %vm214_vm6 = vcmp.eq.s32.totalorder %v515_v1, %v599_v41  ;;  %vm224_vm7 = vcmp.eq.s32.totalorder %v515_v1, %v603_v44 }
  0x47   : > { %v262_v60 = vpack.c.b8 %v261_v57, %v261_v57  ;;  %v188_v61 = vsel %vm184_vm2, 13, %v178_v59  ;;  %vm234_vm8 = vcmp.eq.s32.totalorder %v515_v1, %v609_v46  ;;  %v59_v63 = vsel %vm55_vm4, 0, %v460_v4 }
  0x48   : > { %v198_v62 = vsel %vm194_vm3, 14, %v188_v61  ;;  %vm65_vm9 = vcmp.eq.s32.totalorder %v618_v50, %v521_v3  ;;  %vm75_vm10 = vcmp.eq.s32.totalorder %v618_v50, %v528_v6  ;;  %vm85_vm11 = vcmp.eq.s32.totalorder %v618_v50, %v533_v9 }
  0x49   : > { %272 = vst [vmem:[%s652_s25] sm:$0x3] %v262_v60  ;;  %v208_v0 = vsel %vm204_vm5, 15, %v198_v62  ;;  %v69_v5 = vsel %vm65_vm9, 1, %v59_v63  ;;  %vm95_vm12 = vcmp.eq.s32.totalorder %v618_v50, %v539_v11  ;;  %vm244_vm13 = vcmp.eq.s32.totalorder %v515_v1, %v613_v49 }
  0x4a   : > { %v218_v7 = vsel %vm214_vm6, 16, %v208_v0  ;;  %v79_v8 = vsel %vm75_vm10, 2, %v69_v5  ;;  %vm105_vm14 = vcmp.eq.s32.totalorder %v618_v50, %v543_v14  ;;  %vm254_vm15 = vcmp.eq.s32.totalorder %v515_v1, %v622_v52 }
  0x4b   : > { %v228_v10 = vsel %vm224_vm7, 17, %v218_v7  ;;  %v89_v12 = vsel %vm85_vm11, 3, %v79_v8  ;;  %vm115_vm0 = vcmp.eq.s32.totalorder %v618_v50, %v549_v16  ;;  %vm125_vm1 = vcmp.eq.s32.totalorder %v618_v50, %v553_v19 }
  0x4c   : > { %v238_v13 = vsel %vm234_vm8, 18, %v228_v10  ;;  %v99_v15 = vsel %vm95_vm12, 4, %v89_v12  ;;  %vm135_vm2 = vcmp.eq.s32.totalorder %v618_v50, %v559_v21  ;;  %vm145_vm3 = vcmp.eq.s32.totalorder %v618_v50, %v563_v24 }
  0x4d   : > { %v248_v17 = vsel %vm244_vm13, 19, %v238_v13  ;;  %v109_v18 = vsel %vm105_vm14, 5, %v99_v15  ;;  %vm155_vm4 = vcmp.eq.s32.totalorder %v618_v50, %v569_v26  ;;  %vm165_vm5 = vcmp.eq.s32.totalorder %v618_v50, %v573_v29 }
  0x4e   : > { %v258_v22 = vsel %vm254_vm15, 20, %v248_v17  ;;  %v119_v23 = vsel %vm115_vm0, 6, %v109_v18  ;;  %vm175_vm6 = vcmp.eq.s32.totalorder %v618_v50, %v579_v31  ;;  %vm185_vm7 = vcmp.eq.s32.totalorder %v618_v50, %v583_v34 }
  0x4f   : > { %v263_v25 = vpack.c.b16 %v258_v22, %v258_v22  ;;  %v129_v1 = vsel %vm125_vm1, 7, %v119_v23  ;;  %vm195_vm8 = vcmp.eq.s32.totalorder %v618_v50, %v589_v36  ;;  %vm56_vm9 = vcmp.eq.s32.totalorder %v678_v20, %v517_v2 }
  0x50   : > { %v139_v27 = vsel %vm135_vm2, 8, %v129_v1  ;;  %v60_v33 = vsel %vm56_vm9, 0, %v460_v4  ;;  %vm66_vm10 = vcmp.eq.s32.totalorder %v678_v20, %v521_v3  ;;  %vm76_vm11 = vcmp.eq.s32.totalorder %v678_v20, %v528_v6 }
  0x51   : > { %v264_v28 = vpack.c.b8 %v263_v25, %v263_v25  ;;  %v149_v30 = vsel %vm145_vm3, 9, %v139_v27  ;;  %v70_v37 = vsel %vm66_vm10, 1, %v60_v33  ;;  %vm86_vm12 = vcmp.eq.s32.totalorder %v678_v20, %v533_v9 }
  0x52   : > { %v159_v32 = vsel %vm155_vm4, 10, %v149_v30  ;;  %vm96_vm13 = vcmp.eq.s32.totalorder %v678_v20, %v539_v11  ;;  %vm205_vm14 = vcmp.eq.s32.totalorder %v618_v50, %v593_v39  ;;  %v80_v2 = vsel %vm76_vm11, 2, %v70_v37 }
  0x53   : > { %273 = vst [vmem:[%s652_s25 + $0x2] sm:$0x3] %v264_v28  ;;  %v169_v35 = vsel %vm165_vm5, 11, %v159_v32  ;;  %vm106_vm15 = vcmp.eq.s32.totalorder %v678_v20, %v543_v14  ;;  %vm215_vm0 = vcmp.eq.s32.totalorder %v618_v50, %v599_v41  ;;  %v90_v4 = vsel %vm86_vm12, 3, %v80_v2 }
  0x54   : > { %v179_v38 = vsel %vm175_vm6, 12, %v169_v35  ;;  %vm116_vm1 = vcmp.eq.s32.totalorder %v678_v20, %v549_v16  ;;  %vm225_vm2 = vcmp.eq.s32.totalorder %v618_v50, %v603_v44  ;;  %v100_v9 = vsel %vm96_vm13, 4, %v90_v4 }
  0x55   : > { %v189_v3 = vsel %vm185_vm7, 13, %v179_v38  ;;  %vm126_vm3 = vcmp.eq.s32.totalorder %v678_v20, %v553_v19  ;;  %vm235_vm4 = vcmp.eq.s32.totalorder %v618_v50, %v609_v46  ;;  %v110_v14 = vsel %vm106_vm15, 5, %v100_v9 }
  0x56   : > { %v199_v6 = vsel %vm195_vm8, 14, %v189_v3  ;;  %vm136_vm5 = vcmp.eq.s32.totalorder %v678_v20, %v559_v21  ;;  %vm245_vm6 = vcmp.eq.s32.totalorder %v618_v50, %v613_v49  ;;  %v120_v40 = vsel %vm116_vm1, 6, %v110_v14 }
  0x57   : > { %v209_v11 = vsel %vm205_vm14, 15, %v199_v6  ;;  %vm146_vm7 = vcmp.eq.s32.totalorder %v678_v20, %v563_v24  ;;  %vm255_vm8 = vcmp.eq.s32.totalorder %v618_v50, %v622_v52  ;;  %v130_v19 = vsel %vm126_vm3, 7, %v120_v40 }
  0x58   : > { %v219_v16 = vsel %vm215_vm0, 16, %v209_v11  ;;  %vm156_vm9 = vcmp.eq.s32.totalorder %v678_v20, %v569_v26  ;;  %v140_v45 = vsel %vm136_vm5, 8, %v130_v19  ;;  %vm166_vm10 = vcmp.eq.s32.totalorder %v678_v20, %v573_v29 }
  0x59   : > { %v229_v42 = vsel %vm225_vm2, 17, %v219_v16  ;;  %v150_v47 = vsel %vm146_vm7, 9, %v140_v45  ;;  %vm176_vm11 = vcmp.eq.s32.totalorder %v678_v20, %v579_v31  ;;  %vm186_vm12 = vcmp.eq.s32.totalorder %v678_v20, %v583_v34 }
  0x5a   : > { %v239_v43 = vsel %vm235_vm4, 18, %v229_v42  ;;  %v160_v48 = vsel %vm156_vm9, 10, %v150_v47  ;;  %vm196_vm13 = vcmp.eq.s32.totalorder %v678_v20, %v589_v36  ;;  %vm206_vm14 = vcmp.eq.s32.totalorder %v678_v20, %v593_v39 }
  0x5b   : > { %v249_v21 = vsel %vm245_vm6, 19, %v239_v43  ;;  %v170_v51 = vsel %vm166_vm10, 11, %v160_v48  ;;  %vm216_vm15 = vcmp.eq.s32.totalorder %v678_v20, %v599_v41  ;;  %vm226_vm0 = vcmp.eq.s32.totalorder %v678_v20, %v603_v44 }
  0x5c   : > { %v259_v24 = vsel %vm255_vm8, 20, %v249_v21  ;;  %v180_v26 = vsel %vm176_vm11, 12, %v170_v51  ;;  %vm236_vm1 = vcmp.eq.s32.totalorder %v678_v20, %v609_v46  ;;  %vm246_vm2 = vcmp.eq.s32.totalorder %v678_v20, %v613_v49 }
  0x5d   : > { %v265_v50 = vpack.c.b16 %v259_v24, %v259_v24  ;;  %v190_v53 = vsel %vm186_vm12, 13, %v180_v26  ;;  %vm256_vm3 = vcmp.eq.s32.totalorder %v678_v20, %v622_v52 }
  0x5e   : > { %v200_v31 = vsel %vm196_vm13, 14, %v190_v53 }
  0x5f   : > { %v266_v29 = vpack.c.b8 %v265_v50, %v265_v50  ;;  %v210_v34 = vsel %vm206_vm14, 15, %v200_v31 }
  0x60   : > { %v220_v36 = vsel %vm216_vm15, 16, %v210_v34 }
  0x61   : > { %274 = vst [vmem:[%s652_s25 + $0x4] sm:$0x3] %v266_v29  ;;  %v230_v39 = vsel %vm226_vm0, 17, %v220_v36 }
  0x62   : > { %v240_v54 = vsel %vm236_vm1, 18, %v230_v39 }
  0x63   : > { %v250_v55 = vsel %vm246_vm2, 19, %v240_v54 }
  0x64   : > { %v260_v41 = vsel %vm256_vm3, 20, %v250_v55 }
  0x65   : > { %v267_v56 = vpack.c.b16 %v260_v41, %v260_v41  ;;  %44 = sbr.rel (!%p41_p13) target bundleno = 40 (0x28), region = 45 }
  0x67   : > { %v268_v57 = vpack.c.b8 %v267_v56, %v267_v56 }
  0x69   : > { %275 = vst [vmem:[%s652_s25 + $0x6] sm:$0x3] %v268_v57 }
  0x6a PF:  { %p318_p0 = scmp.ge.s32.totalorder %s772_s0, 1 }
  0x6b   :  { %s452_s26 = smov (!%p318_p0), %s772_s0  }
  0x6c   :  { %319 = sbr.rel (%p318_p0) target bundleno = 121 (0x79), region = 50 }
  0x71 LB: > { %s356_s27 = sshll.u32 %s454_s26, 3  ;;  %v461_v44 = vmov 320017171   ;;  %s279_s26 = sadd.s32 1, %s454_s26   ;;  %s454_s26 = sphi %s452_s26, %s279_s26  }
  0x72   : > { %s284_s28 = scalar_lea.vmem [#allocation8], %s356_s27  ;;  %p278_p1 = scmp.ge.s32.totalorder %s279_s26, 1 }
  0x73   : > { %285 = vst [vmem:[%s284_s28] sm:$0x3] %v461_v44  ;;  %286 = vst [vmem:[%s284_s28 + $0x2] sm:$0x3] %v461_v44 }
  0x74   : > { %287 = vst [vmem:[%s284_s28 + $0x4] sm:$0x3] %v461_v44  ;;  %288 = vst [vmem:[%s284_s28 + $0x6] sm:$0x3] %v461_v44  ;;  %281 = sbr.rel (!%p278_p1) target bundleno = 113 (0x71), region = 56 }
  0x79 PF:  { %s462_s2 = smov [#allocation8]  }
  0x7a   :  { %s294_s29 = sshll.u32 %s462_s2, 4  ;;  %s295_s29 = int_to_ptr.vmem [resolvable:$true] %s294_s29 }
  0x7b   :  { %s414_s30 = scalar_lea.vmem %s295_s29, 128  ;;  %p419_p3 = scmp.lt.s32.totalorder %s295_s29, %s295_s29 }
  0x7c   :  { %p415_p2 = scmp.ne.s32.totalorder %s295_s29, %s414_s30  ;;  %p420_p4 = scmp.lt.s32.totalorder %s414_s30, %s414_s30 }
  0x7e   :  { %p421_p5 = por %p420_p4, %p419_p3 }
  0x80   :  { %p422_p6 = pnand %p421_p5, %p415_p2 }
  0x82   :  { %425 = shalt.err (!%p422_p6)
}
  0x83   :  { %s463_s0 = smov 32   ;;  %s464_s4 = smov 2  }
  0x84   :  { %300 = dma.vmem_to_hbm [thread:$0]  %s295_s29, 128, %s768_s3, [#allocation7], %s463_s0, %s463_s0, %s464_s4  }
  0x85   :  { %446 = dma.done.wait [#allocation7], 128  }
  0x86   :  { %447 = vsyncadd [#allocation7], 4294967168 }
  0x87   :  { %304 = vsyncpa [#allocation6], 1 }
  0x88   :  { %305 = vsyncpa [#allocation7], 1 }

</bundles_post_ra>
